<compile_context>
chip_gen: v7x
topology: tpu7x:2x2x1
jax: 0.10.0
libtpu: 0.0.40
codegen_flags: <defaults>
</compile_context>

<pallas_src>
import functools

import jax
import jax.numpy as jnp
from jax.experimental import pallas as pl
from jax.experimental.pallas import tpu as pltpu

CHANNEL_HSI = 200   # fixed by the module (channel_hsi = 200)
DEPTH = 32          # `depth` global in the original script; chosen deterministically
BN_EPS = 1e-5
MAX_NB = 32         # cap on in-kernel unrolled per-image matmuls


def _ct_kernel(x_ref, w_ref, bias_ref, o_ref):
    # x_ref:    (nb, C_in, t)   f32 activations (nb images x pixel tile)
    # w_ref:    (C_out, C_in)   bf16 1x1-conv weight with BN scale folded in
    # bias_ref: (C_out, 1)      f32 folded BN bias (includes conv bias)
    # o_ref:    (nb, C_out, t)  f32 output tile
    w = w_ref[...]
    b = bias_ref[...]
    nb = x_ref.shape[0]
    for i in range(nb):                         # static, small (<= MAX_NB)
        x = x_ref[i].astype(jnp.bfloat16)       # in-kernel cast: free under DMA
        y = jnp.dot(w, x, preferred_element_type=jnp.float32)
        o_ref[i] = jnp.maximum(y + b, 0.0).astype(o_ref.dtype)


@functools.partial(jax.jit, static_argnames=("t_hw",))
def channel_transformation(x_nchw, conv_w, conv_b, gamma, beta,
                           running_mean, running_var, t_hw=4096):
    """Forward pass of ChannelTransformation (Conv1x1 + BN(eval) + ReLU).

    x_nchw : (N, C_in, H, W) float32
    conv_w : (C_out, C_in, 1, 1)
    conv_b : (C_out,)
    gamma, beta, running_mean, running_var : (C_out,)
    returns: (N, C_out, H, W) float32
    """
    assert t_hw % 128 == 0 and t_hw >= 128
    N, C_in, H, W = x_nchw.shape
    C_out = conv_w.shape[0]
    HW = H * W

    # Fold BN (eval mode): scale goes into the weight, bias is a per-channel add.
    inv_std = jax.lax.rsqrt(running_var + BN_EPS)
    scale = gamma * inv_std                                    # (C_out,)
    bias = beta + (conv_b - running_mean) * scale              # (C_out,)

    w_bf16 = (conv_w.reshape(C_out, C_in) * scale[:, None]).astype(jnp.bfloat16)
    bias2d = bias.reshape(C_out, 1).astype(jnp.float32)

    # Native-NCHW slab: (N, C_in, H*W).  Reshape is free (contiguous).  f32, no
    # cast, no padding -> a single HBM read of the activations.
    x3d = x_nchw.reshape(N, C_in, HW)

    # ---- tile selection -------------------------------------------------
    if HW > t_hw:
        # Large images: one image per step, lane-dense pixel tiles (mult of 128);
        # a ragged last tile is handled by Pallas partial blocks.
        nb, t = 1, t_hw
    else:
        # Small images: whole image in the lane dim, batch nb images per step.
        t = HW
        nb = max(1, min(N, t_hw // max(HW, 1), MAX_NB))
        if N >= 2:
            # Keep >= 2 batch grid steps so both v7x TensorCores get work.
            nb = min(nb, (N + 1) // 2)
        elif HW >= 256:
            # N == 1 and whole image fits one tile: split HW into 2 tiles.
            t = (((HW + 1) // 2) + 127) // 128 * 128

    grid = (pl.cdiv(N, nb), pl.cdiv(HW, t))

    flops = 2 * N * HW * C_in * C_out
    bytes_accessed = (N * C_in * HW * 4          # x (f32)
                      + C_in * C_out * 2         # w (bf16)
                      + C_out * 4                # bias (f32)
                      + N * C_out * HW * 4)      # out (f32)

    out3d = pl.pallas_call(
        _ct_kernel,
        out_shape=jax.ShapeDtypeStruct((N, C_out, HW), jnp.float32),
        grid_spec=pltpu.PrefetchScalarGridSpec(
            num_scalar_prefetch=0,
            grid=grid,
            in_specs=[
                pl.BlockSpec((nb, C_in, t), lambda n, j: (n, 0, j)),
                pl.BlockSpec((C_out, C_in), lambda n, j: (0, 0)),
                pl.BlockSpec((C_out, 1), lambda n, j: (0, 0)),
            ],
            out_specs=pl.BlockSpec((nb, C_out, t), lambda n, j: (n, 0, j)),
        ),
        compiler_params=pltpu.CompilerParams(
            dimension_semantics=("parallel", "parallel")),
        cost_estimate=pl.CostEstimate(flops=flops, transcendentals=0,
                                      bytes_accessed=bytes_accessed),
    )(x3d, w_bf16, bias2d)

    return out3d.reshape(N, C_out, H, W)


def _reference(x_nchw, conv_w, conv_b, gamma, beta, running_mean, running_var,
               cast_bf16=False):
    # Pure-JAX reference (conv1x1 + eval-mode BN + ReLU).
    N, C_in, H, W = x_nchw.shape
    C_out = conv_w.shape[0]
    w = conv_w.reshape(C_out, C_in)
    x = x_nchw.reshape(N, C_in, H * W)
    if cast_bf16:
        inv_std = jax.lax.rsqrt(running_var + BN_EPS)
        scale = gamma * inv_std
        w = (w * scale[:, None]).astype(jnp.bfloat16)
        x = x.astype(jnp.bfloat16)
        y = jnp.einsum("oc,ncp->nop", w, x, preferred_element_type=jnp.float32)
        y = y + (beta + (conv_b - running_mean) * scale)[None, :, None]
    else:
        y = jnp.einsum("oc,ncp->nop", w, x,
                       preferred_element_type=jnp.float32) + conv_b[None, :, None]
        y = ((y - running_mean[None, :, None])
             * jax.lax.rsqrt(running_var + BN_EPS)[None, :, None]
             * gamma[None, :, None] + beta[None, :, None])
    y = jnp.maximum(y, 0.0)
    return y.reshape(N, C_out, H, W)


def _check(x, conv_w, conv_b, gamma, beta, running_mean, running_var):
    out = channel_transformation(x, conv_w, conv_b, gamma, beta,
                                 running_mean, running_var)
    out = jax.block_until_ready(out)
    N, _, H, W = x.shape
    assert out.shape == (N, DEPTH, H, W), out.shape

    # Tight check vs a bf16-matched reference (same precision for the matmul).
    ref_bf16 = _reference(x, conv_w, conv_b, gamma, beta,
                          running_mean, running_var, cast_bf16=True)
    assert jnp.allclose(out, ref_bf16, atol=2e-3, rtol=2e-3), \
        float(jnp.max(jnp.abs(out - ref_bf16)))

    # Looser check vs the full-f32 reference (bf16 rounding of x/w only).
    ref_f32 = _reference(x, conv_w, conv_b, gamma, beta,
                         running_mean, running_var, cast_bf16=False)
    assert jnp.allclose(out, ref_f32, atol=5e-2, rtol=5e-2), \
        float(jnp.max(jnp.abs(out - ref_f32)))


if __name__ == "__main__":
    key = jax.random.PRNGKey(0)
    k_x, k_w, k_b, k_g, k_bt, k_m, k_v, k_x2, k_x3 = jax.random.split(key, 9)

    # Deterministic parameter init (synthetic, not a checkpoint load).
    fan_in = CHANNEL_HSI
    bound = 1.0 / (fan_in ** 0.5)
    conv_w = jax.random.uniform(k_w, (DEPTH, CHANNEL_HSI, 1, 1),
                                minval=-bound, maxval=bound, dtype=jnp.float32)
    conv_b = jax.random.uniform(k_b, (DEPTH,),
                                minval=-bound, maxval=bound, dtype=jnp.float32)
    gamma = jnp.ones((DEPTH,), jnp.float32) \
        + 0.01 * jax.random.normal(k_g, (DEPTH,), dtype=jnp.float32)
    beta = 0.01 * jax.random.normal(k_bt, (DEPTH,), dtype=jnp.float32)
    running_mean = 0.1 * jax.random.normal(k_m, (DEPTH,), dtype=jnp.float32)
    running_var = jnp.abs(jax.random.normal(k_v, (DEPTH,), dtype=jnp.float32)) + 0.5

    params = (conv_w, conv_b, gamma, beta, running_mean, running_var)

    # Case 1: N=2, 16x16 (HW=256, lane-aligned) -> nb=1, grid=(2,1).
    x1 = jax.random.normal(k_x, (2, CHANNEL_HSI, 16, 16), dtype=jnp.float32)
    _check(x1, *params)

    # Case 2: N=4, 16x16 -> nb=2 (in-kernel batched loop), grid=(2,1).
    x2 = jax.random.normal(k_x2, (4, CHANNEL_HSI, 16, 16), dtype=jnp.float32)
    _check(x2, *params)

    # Case 3: N=2, 10x10 (HW=100, not a multiple of 128; block == full dim).
    x3 = jax.random.normal(k_x3, (2, CHANNEL_HSI, 10, 10), dtype=jnp.float32)
    _check(x3, *params)

    print("KERNEL_OK")
</pallas_src>

<mosaic_0001>
module attributes {stable_mosaic.version = 11 : i64} {
  func.func @_ct_kernel(%arg0: i32, %arg1: i32, %arg2: memref<1x200x256xf32, #tpu.memory_space<vmem>>, %arg3: memref<32x200xbf16, #tpu.memory_space<vmem>>, %arg4: memref<32x1xf32, #tpu.memory_space<vmem>>, %arg5: memref<1x32x256xf32, #tpu.memory_space<vmem>>) attributes {dimension_semantics = [#tpu.dimension_semantics<parallel>, #tpu.dimension_semantics<parallel>], iteration_bounds = array<i64: 2, 1>, scalar_prefetch = 0 : i64, scratch_operands = 0 : i64, tpu.core_type = #tpu.core_type<tc>, window_params = [{transform_indices = @transform_0, window_bounds = array<i64: 1, 200, 256>}, {pipeline_mode = #tpu.pipeline_mode<synchronous>, transform_indices = @transform_1, window_bounds = array<i64: 32, 200>}, {pipeline_mode = #tpu.pipeline_mode<synchronous>, transform_indices = @transform_2, window_bounds = array<i64: 32, 1>}, {transform_indices = @transform_3, window_bounds = array<i64: 1, 32, 256>}]} {
    %c0 = arith.constant 0 : index
    %c0_0 = arith.constant 0 : index
    %0 = vector.load %arg3[%c0, %c0_0] : memref<32x200xbf16, #tpu.memory_space<vmem>>, vector<32x200xbf16>
    %c0_1 = arith.constant 0 : index
    %c0_2 = arith.constant 0 : index
    %1 = vector.load %arg4[%c0_1, %c0_2] : memref<32x1xf32, #tpu.memory_space<vmem>>, vector<32x1xf32>
    %c0_3 = arith.constant 0 : index
    %c0_4 = arith.constant 0 : index
    %c0_5 = arith.constant 0 : index
    %2 = vector.load %arg2[%c0_3, %c0_4, %c0_5] : memref<1x200x256xf32, #tpu.memory_space<vmem>>, vector<1x200x256xf32>
    %3 = vector.shape_cast %2 : vector<1x200x256xf32> to vector<200x256xf32>
    %4 = arith.truncf %3 : vector<200x256xf32> to vector<200x256xbf16>
    %cst = arith.constant dense<0.000000e+00> : vector<32x256xf32>
    %5 = tpu.matmul %0, %4, %cst {dimension_numbers = #tpu.dot_dimension_numbers<[1], [0], [0], [1], [0, 0, 1, 1], [], []>} : vector<32x200xbf16>, vector<200x256xbf16>, vector<32x256xf32> -> vector<32x256xf32>
    %6 = vector.broadcast %1 : vector<32x1xf32> to vector<32x256xf32>
    %7 = arith.addf %5, %6 : vector<32x256xf32>
    %cst_6 = arith.constant 0.000000e+00 : f32
    %8 = vector.broadcast %cst_6 : f32 to vector<32x256xf32>
    %9 = arith.maximumf %7, %8 : vector<32x256xf32>
    %c0_7 = arith.constant 0 : index
    %c0_8 = arith.constant 0 : index
    %c0_9 = arith.constant 0 : index
    %10 = vector.load %arg5[%c0_7, %c0_8, %c0_9] : memref<1x32x256xf32, #tpu.memory_space<vmem>>, vector<1x32x256xf32>
    %11 = vector.shape_cast %10 : vector<1x32x256xf32> to vector<32x256xf32>
    %12 = vector.shape_cast %9 : vector<32x256xf32> to vector<1x32x256xf32>
    tpu.vector_store %arg5[%c0_7, %c0_8, %c0_9], %12 {strides = array<i32>} : memref<1x32x256xf32, #tpu.memory_space<vmem>>, vector<1x32x256xf32>,
    return
  }
  func.func @transform_0(%arg0: i32, %arg1: i32) -> (i32, i32, i32) {
    %c0_i32 = arith.constant 0 : i32
    %c0_i32_0 = arith.constant 0 : i32
    return %arg0, %c0_i32, %arg1 : i32, i32, i32
  }
  func.func @transform_1(%arg0: i32, %arg1: i32) -> (i32, i32) {
    %c0_i32 = arith.constant 0 : i32
    %c0_i32_0 = arith.constant 0 : i32
    %c0_i32_1 = arith.constant 0 : i32
    return %c0_i32, %c0_i32_0 : i32, i32
  }
  func.func @transform_2(%arg0: i32, %arg1: i32) -> (i32, i32) {
    %c0_i32 = arith.constant 0 : i32
    %c0_i32_0 = arith.constant 0 : i32
    %c0_i32_1 = arith.constant 0 : i32
    return %c0_i32, %c0_i32_0 : i32, i32
  }
  func.func @transform_3(%arg0: i32, %arg1: i32) -> (i32, i32, i32) {
    %c0_i32 = arith.constant 0 : i32
    %c0_i32_0 = arith.constant 0 : i32
    return %arg0, %c0_i32, %arg1 : i32, i32, i32
  }
}

</mosaic_0001>

<bundles_post_ra>
// kernel: channel_transformation.1
= control target key start
LH: loop header
LB: loop body
LE: loop exit
PB: predicated region body
PF: predicated region fallthrough
CT: control target
= control target key end

     0   :  { %s626_s12 = smov 0   ;;  %s628_s13 = smov 0   ;;  %s739_s0 = inlined_call_operand.vmem [shape: f32[2,200,256], index: 0, kind: input, shape index: {}]   ;;  %s740_s1 = inlined_call_operand.vmem [shape: bf16[32,200], index: 1, kind: input, shape index: {}]   ;;  %s741_s2 = inlined_call_operand.vmem [shape: f32[32,1], index: 2, kind: input, shape index: {}]   ;;  %s742_s3 = inlined_call_operand.vmem [shape: f32[2,32,256], index: 3, kind: output, shape index: {}]  }
   0x1   :  { %s630_s14 = smov 0  }
   0x2 LB: > { %s25_s15 = sadd.s32 1, %s599_s13  ;;  %p507_p0 = scmp.ge.s32.totalorder %s603_s14, 1  ;;  %s603_s14 = sphi %s630_s14, %s13_s14   ;;  %s599_s13 = sphi %s628_s13, %s744_s13   ;;  %s595_s12 = sphi %s626_s12, %s743_s12  }
   0x3   : > { %p27_p1 = scmp.ge.s32.totalorder %s25_s15, 2  ;;  %p158_p2 = scmp.lt.s32.totalorder %s603_s14, 3 }
   0x5   : > { %s746_s15 = smov (%p27_p1, %s25_s15), 0  ;;  %p159_p3 = pnand %p507_p0, %p158_p2 }
   0x6   : > { %p191_p4 = scmp.lt.s32.totalorder (!%p159_p3), %s595_s12, 1  ;;  %v577_v0 = vld [vmem:[%s740_s1 + $0x4] ss:$8 sps:$4 sm:$0xff] (!%p159_p3)   ;;  %vm333_vm0 = vcmask (!%p159_p3), 588800   ;;  %v580_v1 = vld [vmem:[%s740_s1 + $0x14] ss:$8 sps:$4 sm:$0xff] (!%p159_p3)  }
   0x7   : > { %162 = sbr.rel (%p159_p3) target bundleno = 293 (0x125), region = 32  ;;  %v605_v2 = vmov (!%p159_p3), 0   ;;  %v217_v3 = vld [vmem:[%s741_s2 + $0x10] sm:$0xff] (!%p159_p3)  ;;  %516 = vmatprep.mubr.msk.bf16.mxu0 (!%p159_p3), %vm333_vm0, %v577_v0  ;;  %v215_v4 = vld [vmem:[%s741_s2] sm:$0xff] (!%p159_p3)  ;;  %517 = vmatprep.mubr.msk.bf16.mxu1 (!%p159_p3), %vm333_vm0, %v580_v1  ;;  %v218_v5 = vld [vmem:[%s741_s2 + $0x18] sm:$0xff] (!%p159_p3)  ;;  %vm340_vm1 = vcmask (!%p159_p3), 1043456  }
   0x8   : > { %574 = vset.pattern.permute.xlu1 (!%p159_p3), %v605_v2  ;;  %573 = vset.pattern.permute.xlu0 (!%p159_p3), %v605_v2  ;;  %v216_v6 = vld [vmem:[%s741_s2 + $0x8] sm:$0xff] (!%p159_p3) }
   0x9   : > { %307 = vperm.xlu1 (!%p159_p3), %574, %v217_v3   ;;  %297 = vperm.xlu0 (!%p159_p3), %573, %v215_v4  }
   0xd   : > { %312 = vperm.xlu1 (!%p159_p3), %574, %v218_v5   ;;  %302 = vperm.xlu0 (!%p159_p3), %573, %v216_v6  }
   0xe   : > { %s748_s12 = smov (!%p191_p4, %s595_s12), 1 }
   0xf   : > { %s547_s24 = smul.u32 400, %s748_s12  ;;  %s520_s9 = sshll.u32 %s748_s12, 6 }
  0x10   : > { %s208_s16 = scalar_lea.vmem %s742_s3, %s520_s9 }
  0x11   : > { %s668_s4 = scalar_lea.vmem %s739_s0, %s547_s24 }
  0x12   : > { %v220_v7 = vld [vmem:[%s668_s4 + $0x8] sm:$0xff]  ;;  %v222_v8 = vld [vmem:[%s668_s4 + $0x18] sm:$0xff]  ;;  %v219_v9 = vld [vmem:[%s668_s4] sm:$0xff] }
  0x13   : > { %v270_v10 = vpack.c.bf16 %v222_v8, %v220_v7  ;;  %v221_v11 = vld [vmem:[%s668_s4 + $0x10] sm:$0xff]  ;;  %v224_v12 = vld [vmem:[%s668_s4 + $0x28] sm:$0xff]  ;;  %v226_v13 = vld [vmem:[%s668_s4 + $0x38] sm:$0xff] }
  0x14   : > { %v269_v14 = vpack.c.bf16 %v221_v11, %v219_v9  ;;  %v272_v15 = vpack.c.bf16 %v226_v13, %v224_v12  ;;  %v223_v16 = vld [vmem:[%s668_s4 + $0x20] sm:$0xff]  ;;  %v225_v17 = vld [vmem:[%s668_s4 + $0x30] sm:$0xff]  ;;  %v228_v18 = vld [vmem:[%s668_s4 + $0x48] sm:$0xff] }
  0x15   : > { %347 = vmatprep.subr.bf16.mxu0 %v270_v10  ;;  %521 = vmatprep.subr.bf16.mxu1 %v270_v10  ;;  %v230_v19 = vld [vmem:[%s668_s4 + $0x58] sm:$0xff]  ;;  %v271_v20 = vpack.c.bf16 %v225_v17, %v223_v16  ;;  %v227_v22 = vld [vmem:[%s668_s4 + $0x40] sm:$0xff]  ;;  %v229_v23 = vld [vmem:[%s668_s4 + $0x50] sm:$0xff] }
  0x16   : > { %348 = vmatpush1.bf16.msra.mxu0 %v269_v14  ;;  %534 = vmatpush1.bf16.msra.mxu1 %v269_v14  ;;  %v274_v21 = vpack.c.bf16 %v230_v19, %v228_v18  ;;  %v232_v24 = vld [vmem:[%s668_s4 + $0x68] sm:$0xff]  ;;  %v234_v25 = vld [vmem:[%s668_s4 + $0x78] sm:$0xff]  ;;  %v273_v26 = vpack.c.bf16 %v229_v23, %v227_v22  ;;  %v231_v28 = vld [vmem:[%s668_s4 + $0x60] sm:$0xff] }
  0x17   : > { %349 = vmatprep.subr.bf16.mxu0 %v272_v15  ;;  %522 = vmatprep.subr.bf16.mxu1 %v272_v15  ;;  %v276_v27 = vpack.c.bf16 %v234_v25, %v232_v24  ;;  %v233_v29 = vld [vmem:[%s668_s4 + $0x70] sm:$0xff]  ;;  %v236_v30 = vld [vmem:[%s668_s4 + $0x88] sm:$0xff]  ;;  %v238_v31 = vld [vmem:[%s668_s4 + $0x98] sm:$0xff] }
  0x18   : > { %v275_v32 = vpack.c.bf16 %v233_v29, %v231_v28  ;;  %v278_v33 = vpack.c.bf16 %v238_v31, %v236_v30  ;;  %v235_v34 = vld [vmem:[%s668_s4 + $0x80] sm:$0xff]  ;;  %v237_v35 = vld [vmem:[%s668_s4 + $0x90] sm:$0xff]  ;;  %v240_v36 = vld [vmem:[%s668_s4 + $0xa8] sm:$0xff] }
  0x19   : > { %v242_v37 = vld [vmem:[%s668_s4 + $0xb8] sm:$0xff]  ;;  %v277_v38 = vpack.c.bf16 %v237_v35, %v235_v34  ;;  %v239_v40 = vld [vmem:[%s668_s4 + $0xa0] sm:$0xff]  ;;  %v241_v41 = vld [vmem:[%s668_s4 + $0xb0] sm:$0xff] }
  0x1a   : > { %350 = vmatpush1.bf16.msra.mxu0 %v271_v20  ;;  %535 = vmatpush1.bf16.msra.mxu1 %v271_v20  ;;  %v280_v39 = vpack.c.bf16 %v242_v37, %v240_v36  ;;  %v244_v42 = vld [vmem:[%s668_s4 + $0xc8] sm:$0xff]  ;;  %v246_v43 = vld [vmem:[%s668_s4 + $0xd8] sm:$0xff]  ;;  %v279_v44 = vpack.c.bf16 %v241_v41, %v239_v40  ;;  %v243_v46 = vld [vmem:[%s668_s4 + $0xc0] sm:$0xff] }
  0x1b   : > { %351 = vmatprep.subr.bf16.mxu0 %v274_v21  ;;  %523 = vmatprep.subr.bf16.mxu1 %v274_v21  ;;  %v282_v45 = vpack.c.bf16 %v246_v43, %v244_v42  ;;  %v245_v47 = vld [vmem:[%s668_s4 + $0xd0] sm:$0xff]  ;;  %v248_v48 = vld [vmem:[%s668_s4 + $0xe8] sm:$0xff]  ;;  %v250_v49 = vld [vmem:[%s668_s4 + $0xf8] sm:$0xff] }
  0x1c   : > { %v281_v50 = vpack.c.bf16 %v245_v47, %v243_v46  ;;  %v284_v51 = vpack.c.bf16 %v250_v49, %v248_v48  ;;  %v247_v52 = vld [vmem:[%s668_s4 + $0xe0] sm:$0xff]  ;;  %v249_v53 = vld [vmem:[%s668_s4 + $0xf0] sm:$0xff]  ;;  %v252_v54 = vld [vmem:[%s668_s4 + $0x108] sm:$0xff] }
  0x1d   : > { %v254_v55 = vld [vmem:[%s668_s4 + $0x118] sm:$0xff]  ;;  %v283_v56 = vpack.c.bf16 %v249_v53, %v247_v52  ;;  %v251_v58 = vld [vmem:[%s668_s4 + $0x100] sm:$0xff]  ;;  %v253_v59 = vld [vmem:[%s668_s4 + $0x110] sm:$0xff] }
  0x1e   : > { %352 = vmatpush1.bf16.msra.mxu0 %v273_v26  ;;  %536 = vmatpush1.bf16.msra.mxu1 %v273_v26  ;;  %v286_v57 = vpack.c.bf16 %v254_v55, %v252_v54  ;;  %v256_v60 = vld [vmem:[%s668_s4 + $0x128] sm:$0xff]  ;;  %v258_v61 = vld [vmem:[%s668_s4 + $0x138] sm:$0xff]  ;;  %v285_v62 = vpack.c.bf16 %v253_v59, %v251_v58  ;;  %v255_v0 = vld [vmem:[%s668_s4 + $0x120] sm:$0xff] }
  0x1f   : > { %353 = vmatprep.subr.bf16.mxu0 %v276_v27  ;;  %524 = vmatprep.subr.bf16.mxu1 %v276_v27  ;;  %v288_v63 = vpack.c.bf16 %v258_v61, %v256_v60  ;;  %v257_v1 = vld [vmem:[%s668_s4 + $0x130] sm:$0xff]  ;;  %v260_v2 = vld [vmem:[%s668_s4 + $0x148] sm:$0xff]  ;;  %v262_v3 = vld [vmem:[%s668_s4 + $0x158] sm:$0xff] }
  0x20   : > { %v287_v4 = vpack.c.bf16 %v257_v1, %v255_v0  ;;  %v290_v5 = vpack.c.bf16 %v262_v3, %v260_v2  ;;  %v259_v6 = vld [vmem:[%s668_s4 + $0x140] sm:$0xff]  ;;  %v261_v7 = vld [vmem:[%s668_s4 + $0x150] sm:$0xff]  ;;  %v264_v8 = vld [vmem:[%s668_s4 + $0x168] sm:$0xff] }
  0x21   : > { %v266_v9 = vld [vmem:[%s668_s4 + $0x178] sm:$0xff]  ;;  %v289_v10 = vpack.c.bf16 %v261_v7, %v259_v6  ;;  %v263_v12 = vld [vmem:[%s668_s4 + $0x160] sm:$0xff]  ;;  %v265_v13 = vld [vmem:[%s668_s4 + $0x170] sm:$0xff] }
  0x22   : > { %354 = vmatpush1.bf16.msra.mxu0 %v275_v32  ;;  %537 = vmatpush1.bf16.msra.mxu1 %v275_v32  ;;  %v292_v11 = vpack.c.bf16 %v266_v9, %v264_v8  ;;  %v268_v14 = vld [vmem:[%s668_s4 + $0x188] sm:$0xff]  ;;  %v267_v15 = vld [vmem:[%s668_s4 + $0x180] sm:$0xff]  ;;  %v291_v16 = vpack.c.bf16 %v265_v13, %v263_v12  ;;  %v578_v21 = vld [vmem:[%s740_s1 + $0x10] ss:$8 sps:$4 sm:$0xff]  }
  0x23   : > { %355 = vmatprep.subr.bf16.mxu0 %v278_v33  ;;  %525 = vmatprep.subr.bf16.mxu1 %v278_v33  ;;  %v294_v17 = vpack.c.bf16 %v268_v14, %v268_v14  ;;  %v293_v18 = vpack.c.bf16 %v267_v15, %v267_v15  ;;  %v575_v20 = vld [vmem:[%s740_s1] ss:$8 sps:$4 sm:$0xff]  }
  0x25   : > { %v342_v19 = vsel %vm340_vm1, %v293_v18, 0 }
  0x26   : > { %356 = vmatpush1.bf16.msra.mxu0 %v277_v38  ;;  %538 = vmatpush1.bf16.msra.mxu1 %v277_v38 }
  0x27   : > { %357 = vmatprep.subr.bf16.mxu0 %v280_v39  ;;  %526 = vmatprep.subr.bf16.mxu1 %v280_v39 }
  0x2a   : > { %358 = vmatpush1.bf16.msra.mxu0 %v279_v44  ;;  %539 = vmatpush1.bf16.msra.mxu1 %v279_v44 }
  0x2b   : > { %359 = vmatprep.subr.bf16.mxu0 %v282_v45  ;;  %527 = vmatprep.subr.bf16.mxu1 %v282_v45 }
  0x2e   : > { %360 = vmatpush1.bf16.msra.mxu0 %v281_v50  ;;  %540 = vmatpush1.bf16.msra.mxu1 %v281_v50 }
  0x2f   : > { %361 = vmatprep.subr.bf16.mxu0 %v284_v51  ;;  %528 = vmatprep.subr.bf16.mxu1 %v284_v51 }
  0x32   : > { %362 = vmatpush1.bf16.msra.mxu0 %v283_v56  ;;  %541 = vmatpush1.bf16.msra.mxu1 %v283_v56 }
  0x33   : > { %363 = vmatprep.subr.bf16.mxu0 %v286_v57  ;;  %529 = vmatprep.subr.bf16.mxu1 %v286_v57 }
  0x36   : > { %364 = vmatpush1.bf16.msra.mxu0 %v285_v62  ;;  %542 = vmatpush1.bf16.msra.mxu1 %v285_v62 }
  0x37   : > { %365 = vmatprep.subr.bf16.mxu0 %v288_v63  ;;  %530 = vmatprep.subr.bf16.mxu1 %v288_v63 }
  0x3a   : > { %366 = vmatpush1.bf16.msra.mxu0 %v287_v4  ;;  %543 = vmatpush1.bf16.msra.mxu1 %v287_v4 }
  0x3b   : > { %367 = vmatprep.subr.bf16.mxu0 %v290_v5  ;;  %531 = vmatprep.subr.bf16.mxu1 %v290_v5 }
  0x3e   : > { %368 = vmatpush1.bf16.msra.mxu0 %v289_v10  ;;  %544 = vmatpush1.bf16.msra.mxu1 %v289_v10 }
  0x3f   : > { %369 = vmatprep.subr.bf16.mxu0 %v292_v11  ;;  %532 = vmatprep.subr.bf16.mxu1 %v292_v11 }
  0x42   : > { %370 = vmatpush1.bf16.msra.mxu0 %v291_v16  ;;  %545 = vmatpush1.bf16.msra.mxu1 %v291_v16 }
  0x43   : > { %515 = vmatprep.subr.msk.bf16.mxu0 %vm340_vm1, %v294_v17  ;;  %533 = vmatprep.subr.msk.bf16.mxu1 %vm340_vm1, %v294_v17 }
  0x46   : > { %372 = vmatpush1.bf16.msra.mxu0 %v342_v19  ;;  %546 = vmatpush1.bf16.msra.mxu1 %v342_v19 }
  0x49   : > { %380 = vmatmul.mubr.bf16.vlgmr.msra.gmra.mrb[0].mxu0 %v575_v20  ;;  %390 = vmatmul.mubr.bf16.vlgmr.msra.gmra.mrb[0].mxu1 %v578_v21 }
  0x88   : > { %v308_v22 = vpop.permute.xlu1 %307  ;;  %v298_v23 = vpop.permute.xlu0 %297 }
  0x8c   : > { %v313_v24 = vpop.permute.xlu1 %312  ;;  %v303_v25 = vpop.permute.xlu0 %302 }
 0x11c   : > { %v381_v26 = vpop.f32.mrb[0].mxu0  ;;  %v391_v27 = vpop.f32.mrb[0].mxu1 }
 0x11d   : > { %v382_v28 = vadd.f32 %v381_v26, %v298_v23  ;;  %v392_v29 = vadd.f32 %v391_v27, %v308_v22  ;;  %v383_v30 = vpop.f32.mrb[1].mxu0  ;;  %v393_v31 = vpop.f32.mrb[1].mxu1 }
 0x11e   : > { %v384_v32 = vadd.f32 %v383_v30, %v298_v23  ;;  %v394_v33 = vadd.f32 %v393_v31, %v308_v22  ;;  %v385_v34 = vpop.f32.mrb[2].mxu0  ;;  %v395_v35 = vpop.f32.mrb[2].mxu1 }
 0x11f   : > { %v400_v36 = vmax.f32 %v382_v28, 0.0  ;;  %v404_v37 = vmax.f32 %v392_v29, 0.0  ;;  %v386_v38 = vadd.f32 %v385_v34, %v303_v25  ;;  %v396_v39 = vadd.f32 %v395_v35, %v313_v24  ;;  %v387_v40 = vpop.f32.mrb[3].mxu0  ;;  %v397_v41 = vpop.f32.mrb[3].mxu1 }
 0x120   : > { %v401_v42 = vmax.f32 %v384_v32, 0.0  ;;  %v405_v43 = vmax.f32 %v394_v33, 0.0  ;;  %v388_v44 = vadd.f32 %v387_v40, %v303_v25  ;;  %v398_v45 = vadd.f32 %v397_v41, %v313_v24 }
 0x121   : > { %408 = vst [vmem:[%s208_s16] sm:$0xff] %v400_v36  ;;  %412 = vst [vmem:[%s208_s16 + $0x20] sm:$0xff] %v404_v37  ;;  %v402_v46 = vmax.f32 %v386_v38, 0.0  ;;  %v406_v47 = vmax.f32 %v396_v39, 0.0 }
 0x122   : > { %409 = vst [vmem:[%s208_s16 + $0x8] sm:$0xff] %v401_v42  ;;  %413 = vst [vmem:[%s208_s16 + $0x28] sm:$0xff] %v405_v43  ;;  %v403_v48 = vmax.f32 %v388_v44, 0.0  ;;  %v407_v49 = vmax.f32 %v398_v45, 0.0 }
 0x123   : > { %410 = vst [vmem:[%s208_s16 + $0x10] sm:$0xff] %v402_v46  ;;  %414 = vst [vmem:[%s208_s16 + $0x30] sm:$0xff] %v406_v47 }
 0x124   : > { %411 = vst [vmem:[%s208_s16 + $0x18] sm:$0xff] %v403_v48  ;;  %415 = vst [vmem:[%s208_s16 + $0x38] sm:$0xff] %v407_v49 }
 0x125 PF: > { %s13_s14 = sadd.s32 1, %s603_s14   ;;  %s743_s12 = smov %s599_s13 }
 0x126   : > { %p10_p5 = scmp.ge.s32.totalorder %s13_s14, 4   ;;  %s744_s13 = smov %s746_s15 }
 0x128   :  { %12 = sbr.rel (!%p10_p5) target bundleno = 2 (0x2), region = 62 }

</bundles_post_ra>
